<compile_context>
chip_gen: v5e
topology: v5e:2x2
jax: 0.10.0
libtpu: 0.0.40
codegen_flags: <defaults>
</compile_context>

<pallas_src>
import functools

import jax
import jax.numpy as jnp
import numpy as np
from jax.experimental import pallas as pl
from jax.experimental.pallas import tpu as pltpu

_LANE = 128      # lane width (last-dim tiling unit)
_OUT_PAD = 128   # pad the 2-logit output to a full lane-dense slab


def _round_up(x, m):
    return (x + m - 1) // m * m


def _mlp2_kernel(x_ref, w1_ref, b1_ref, w2_ref, b2_ref, o_ref, acc_ref):
    """One (batch_tile, block_k) grid step of the fused Linear -> ReLU -> Linear.

    x_ref : (TB, BK)       input tile (native dtype, e.g. f32 or bf16)
    w1_ref: (BK, H1)       layer-1 weight chunk ([in, out])
    b1_ref: (1, H1)        layer-1 bias (f32)
    w2_ref: (H1, O_pad)    layer-2 weight, padded to 128 lanes
    b2_ref: (1, O_pad)     layer-2 bias, padded to 128 lanes (f32)
    o_ref : (TB, O_pad)    output tile (f32), written only on the last K step
    acc_ref: (TB, H1) f32  layer-1 accumulator scratch (persists across K steps)
    """
    k = pl.program_id(1)
    nk = pl.num_programs(1)

    @pl.when(k == 0)
    def _init():
        acc_ref[...] = jnp.zeros_like(acc_ref)

    # Layer-1 partial matmul on the MXU; f32 accumulation regardless of input dtype.
    acc_ref[...] += jnp.dot(x_ref[...], w1_ref[...],
                            preferred_element_type=jnp.float32)

    @pl.when(k == nk - 1)
    def _finalize():
        h = jnp.maximum(acc_ref[...] + b1_ref[...], 0.0)            # bias + ReLU
        logits = jnp.dot(h.astype(w2_ref.dtype), w2_ref[...],
                         preferred_element_type=jnp.float32)
        logits = logits + b2_ref[...]
        o_ref[...] = logits.astype(o_ref.dtype)


def two_layer_tfidf_forward(
    x,
    params,
    *,
    batch_tile=256,
    block_k=None,
    compute_dtype=None,
    resident_w1_bytes=12 * 1024 * 1024,
):
    """Fused forward pass of TwoLayerTFIDF (2-layer branch).

    x      : [B, input_dim]
    params : dict with w1 [H1, D], b1 [H1], w2 [2, H1], b2 [2]  (PyTorch Linear convention)
    compute_dtype : optional streaming dtype for x / w1 / w2 (e.g. jnp.bfloat16);
                    accumulation and output stay f32.
    """
    B, D = x.shape
    w1, b1, w2, b2 = params["w1"], params["b1"], params["w2"], params["b2"]
    H1 = w1.shape[0]
    O = w2.shape[0]  # == 2

    cd = compute_dtype if compute_dtype is not None else x.dtype
    esize = np.dtype(cd).itemsize

    # ---- batch tile: large (<=256 rows), multiple of 16, with a zero-padded tail ----
    bt = max(16, min(int(batch_tile), _round_up(B, 16)))
    bt = _round_up(bt, 16)
    B_pad = _round_up(B, bt)

    # ---- K tile: keep w1 resident when it fits a v7x-safe VMEM budget, else tile D ----
    if block_k is None:
        if (D * H1 + bt * D) * esize <= resident_w1_bytes:
            block_k = D                                   # whole w1 + x-row tile resident
        else:
            per_k = (H1 + bt) * esize                     # bytes per K element (w1 row + x col)
            block_k = max(_LANE, (resident_w1_bytes // per_k) // _LANE * _LANE)
    if block_k != D:
        block_k = min(max(_LANE, (block_k // _LANE) * _LANE), _round_up(D, _LANE))
    D_pad = _round_up(D, block_k)
    nk = D_pad // block_k

    # ---- glue: cast / transpose / zero-pad (all semantics-preserving) ----
    x_c = x.astype(cd)
    if B_pad != B or D_pad != D:
        x_c = jnp.pad(x_c, ((0, B_pad - B), (0, D_pad - D)))

    w1_t = w1.T.astype(cd)                                # (D, H1)
    if D_pad != D:
        w1_t = jnp.pad(w1_t, ((0, D_pad - D), (0, 0)))    # zero rows -> zero contribution

    b1_r = b1.astype(jnp.float32).reshape(1, H1)

    # Lane-dense layer 2: pad the 2 output columns to a full 128-lane slab (zeros).
    O_pad = _round_up(max(O, _OUT_PAD), _LANE)
    w2_t = jnp.pad(w2.T.astype(cd), ((0, 0), (0, O_pad - O)))                    # (H1, O_pad)
    b2_r = jnp.pad(b2.astype(jnp.float32).reshape(1, O), ((0, 0), (0, O_pad - O)))

    grid = (B_pad // bt, nk)

    in_specs = [
        pl.BlockSpec((bt, block_k), lambda i, k: (i, k)),     # x tile (batch x K)
        pl.BlockSpec((block_k, H1), lambda i, k: (k, 0)),     # w1 chunk (resident when nk==1)
        pl.BlockSpec((1, H1), lambda i, k: (0, 0)),           # b1 (broadcast)
        pl.BlockSpec((H1, O_pad), lambda i, k: (0, 0)),       # w2 (broadcast, lane-dense)
        pl.BlockSpec((1, O_pad), lambda i, k: (0, 0)),        # b2 (broadcast, lane-dense)
    ]
    out_spec = pl.BlockSpec((bt, O_pad), lambda i, k: (i, 0))

    # ---- explicit VMEM budget from actual tile sizes (v7x 64 MiB safe) ----
    f32 = 4
    tile_bytes = (
        2 * bt * block_k * esize        # x tile, double-buffered
        + 2 * block_k * H1 * esize      # w1 block, double-buffered
        + 2 * (H1 + 1) * O_pad * f32    # w2 + b2
        + 2 * H1 * f32                  # b1
        + bt * H1 * f32                 # accumulator scratch
        + 2 * bt * O_pad * f32          # output tile, double-buffered
    )
    vmem_limit = int(min(max(2 * tile_bytes, 16 * 1024 * 1024), 56 * 1024 * 1024))

    out = pl.pallas_call(
        _mlp2_kernel,
        out_shape=jax.ShapeDtypeStruct((B_pad, O_pad), jnp.float32),
        grid_spec=pltpu.PrefetchScalarGridSpec(
            num_scalar_prefetch=0,
            grid=grid,
            in_specs=in_specs,
            out_specs=out_spec,
            scratch_shapes=[pltpu.VMEM((bt, H1), jnp.float32)],
        ),
        compiler_params=pltpu.CompilerParams(
            dimension_semantics=("parallel", "arbitrary"),
            vmem_limit_bytes=vmem_limit,
        ),
    )(x_c, w1_t, b1_r, w2_t, b2_r)

    return out[:B, :O]


def init_params(key, input_dim, hidden_dim1, out_dim=2, dtype=jnp.float32):
    """Deterministic parameter init matching nn.Linear shapes (uniform, PyTorch-style)."""
    k1, k2, k3, k4 = jax.random.split(key, 4)
    bound1 = 1.0 / jnp.sqrt(input_dim)
    bound2 = 1.0 / jnp.sqrt(hidden_dim1)
    return {
        "w1": jax.random.uniform(k1, (hidden_dim1, input_dim), dtype, -bound1, bound1),
        "b1": jax.random.uniform(k2, (hidden_dim1,), dtype, -bound1, bound1),
        "w2": jax.random.uniform(k3, (out_dim, hidden_dim1), dtype, -bound2, bound2),
        "b2": jax.random.uniform(k4, (out_dim,), dtype, -bound2, bound2),
    }


def reference_forward(x, params):
    """Plain-JAX reference of the PyTorch module (two-layer branch)."""
    h = jnp.maximum(x @ params["w1"].T + params["b1"], 0.0)
    return h @ params["w2"].T + params["b2"]


# TODO(synk): the optional hidden_dim2 (3-layer) branch of the PyTorch module is not built
#             here; it would add one more fused matmul+bias+ReLU stage before layer 2.

if __name__ == "__main__":
    batch = 16
    input_dim = 32
    hidden_dim1 = 32

    key = jax.random.PRNGKey(0)
    kx, kp = jax.random.split(key)
    x = jax.random.normal(kx, (batch, input_dim), jnp.float32)
    params = init_params(kp, input_dim, hidden_dim1)
    ref = reference_forward(x, params)

    # 1) f32 path, resident w1 (nk == 1): exact semantics of the PyTorch module.
    fwd = jax.jit(functools.partial(two_layer_tfidf_forward, batch_tile=256))
    out = jax.block_until_ready(fwd(x, params))
    assert out.shape == (batch, 2), out.shape
    assert jnp.allclose(out, ref, atol=1e-5, rtol=1e-5), float(jnp.max(jnp.abs(out - ref)))

    # 2) K-tiled path (forced block_k=128 on a wider input) exercising the accumulator /
    #    pl.when init-finalize machinery used for vocab-sized w1 on v7x.
    input_dim2 = 256
    x2 = jax.random.normal(kx, (batch, input_dim2), jnp.float32)
    params2 = init_params(kp, input_dim2, hidden_dim1)
    fwd_kt = jax.jit(functools.partial(two_layer_tfidf_forward, batch_tile=256, block_k=128))
    out2 = jax.block_until_ready(fwd_kt(x2, params2))
    ref2 = reference_forward(x2, params2)
    assert jnp.allclose(out2, ref2, atol=1e-3, rtol=1e-3), float(jnp.max(jnp.abs(out2 - ref2)))

    # 3) bf16 streaming path (memory-bound win on all chips); f32 accumulation, loose check.
    fwd_bf16 = jax.jit(functools.partial(two_layer_tfidf_forward, compute_dtype=jnp.bfloat16))
    out3 = jax.block_until_ready(fwd_bf16(x, params))
    assert jnp.allclose(out3, ref, atol=5e-2, rtol=5e-2), float(jnp.max(jnp.abs(out3 - ref)))

    print("KERNEL_OK")
</pallas_src>

<mosaic_0001>
module attributes {stable_mosaic.version = 11 : i64} {
  func.func @_mlp2_kernel(%arg0: i32, %arg1: i32, %arg2: memref<16x32xf32, #tpu.memory_space<vmem>>, %arg3: memref<32x32xf32, #tpu.memory_space<vmem>>, %arg4: memref<1x32xf32, #tpu.memory_space<vmem>>, %arg5: memref<32x128xf32, #tpu.memory_space<vmem>>, %arg6: memref<1x128xf32, #tpu.memory_space<vmem>>, %arg7: memref<16x128xf32, #tpu.memory_space<vmem>>, %arg8: memref<16x32xf32, #tpu.memory_space<vmem>>) attributes {dimension_semantics = [#tpu.dimension_semantics<parallel>, #tpu.dimension_semantics<arbitrary>], iteration_bounds = array<i64: 1, 1>, scalar_prefetch = 0 : i64, scratch_operands = 1 : i64, tpu.core_type = #tpu.core_type<tc>, window_params = [{transform_indices = @transform_0, window_bounds = array<i64: 16, 32>}, {transform_indices = @transform_1, window_bounds = array<i64: 32, 32>}, {pipeline_mode = #tpu.pipeline_mode<synchronous>, transform_indices = @transform_2, window_bounds = array<i64: 1, 32>}, {pipeline_mode = #tpu.pipeline_mode<synchronous>, transform_indices = @transform_3, window_bounds = array<i64: 32, 128>}, {pipeline_mode = #tpu.pipeline_mode<synchronous>, transform_indices = @transform_4, window_bounds = array<i64: 1, 128>}, {transform_indices = @transform_5, window_bounds = array<i64: 16, 128>}]} {
    %c0_i32 = arith.constant 0 : i32
    %0 = arith.cmpi eq, %arg1, %c0_i32 : i32
    %1 = arith.extui %0 : i1 to i32
    %c0_i32_0 = arith.constant 0 : i32
    %2 = arith.cmpi ne, %1, %c0_i32_0 : i32
    scf.if %2 {
      %cst_10 = arith.constant 0.000000e+00 : f32
      %12 = vector.broadcast %cst_10 : f32 to vector<16x32xf32>
      %c0_11 = arith.constant 0 : index
      %c0_12 = arith.constant 0 : index
      %13 = vector.load %arg8[%c0_11, %c0_12] : memref<16x32xf32, #tpu.memory_space<vmem>>, vector<16x32xf32>
      tpu.vector_store %arg8[%c0_11, %c0_12], %12 {strides = array<i32>} : memref<16x32xf32, #tpu.memory_space<vmem>>, vector<16x32xf32>,
    } else {
    }
    %c0 = arith.constant 0 : index
    %c0_1 = arith.constant 0 : index
    %3 = vector.load %arg8[%c0, %c0_1] : memref<16x32xf32, #tpu.memory_space<vmem>>, vector<16x32xf32>
    %c0_2 = arith.constant 0 : index
    %c0_3 = arith.constant 0 : index
    %4 = vector.load %arg2[%c0_2, %c0_3] : memref<16x32xf32, #tpu.memory_space<vmem>>, vector<16x32xf32>
    %c0_4 = arith.constant 0 : index
    %c0_5 = arith.constant 0 : index
    %5 = vector.load %arg3[%c0_4, %c0_5] : memref<32x32xf32, #tpu.memory_space<vmem>>, vector<32x32xf32>
    %cst = arith.constant dense<0.000000e+00> : vector<16x32xf32>
    %6 = tpu.matmul %4, %5, %cst {dimension_numbers = #tpu.dot_dimension_numbers<[1], [0], [0], [1], [0, 0, 1, 1], [], []>} : vector<16x32xf32>, vector<32x32xf32>, vector<16x32xf32> -> vector<16x32xf32>
    %7 = arith.addf %3, %6 : vector<16x32xf32>
    %c0_6 = arith.constant 0 : index
    %c0_7 = arith.constant 0 : index
    %8 = vector.load %arg8[%c0_6, %c0_7] : memref<16x32xf32, #tpu.memory_space<vmem>>, vector<16x32xf32>
    tpu.vector_store %arg8[%c0_6, %c0_7], %7 {strides = array<i32>} : memref<16x32xf32, #tpu.memory_space<vmem>>, vector<16x32xf32>,
    %c0_i32_8 = arith.constant 0 : i32
    %9 = arith.cmpi eq, %arg1, %c0_i32_8 : i32
    %10 = arith.extui %9 : i1 to i32
    %c0_i32_9 = arith.constant 0 : i32
    %11 = arith.cmpi ne, %10, %c0_i32_9 : i32
    scf.if %11 {
      %c0_10 = arith.constant 0 : index
      %c0_11 = arith.constant 0 : index
      %12 = vector.load %arg8[%c0_10, %c0_11] : memref<16x32xf32, #tpu.memory_space<vmem>>, vector<16x32xf32>
      %c0_12 = arith.constant 0 : index
      %c0_13 = arith.constant 0 : index
      %13 = vector.load %arg4[%c0_12, %c0_13] : memref<1x32xf32, #tpu.memory_space<vmem>>, vector<1x32xf32>
      %14 = vector.broadcast %13 : vector<1x32xf32> to vector<16x32xf32>
      %15 = arith.addf %12, %14 : vector<16x32xf32>
      %cst_14 = arith.constant 0.000000e+00 : f32
      %16 = vector.broadcast %cst_14 : f32 to vector<16x32xf32>
      %17 = arith.maximumf %15, %16 : vector<16x32xf32>
      %c0_15 = arith.constant 0 : index
      %c0_16 = arith.constant 0 : index
      %18 = vector.load %arg5[%c0_15, %c0_16] : memref<32x128xf32, #tpu.memory_space<vmem>>, vector<32x128xf32>
      %cst_17 = arith.constant dense<0.000000e+00> : vector<16x128xf32>
      %19 = tpu.matmul %17, %18, %cst_17 {dimension_numbers = #tpu.dot_dimension_numbers<[1], [0], [0], [1], [0, 0, 1, 1], [], []>} : vector<16x32xf32>, vector<32x128xf32>, vector<16x128xf32> -> vector<16x128xf32>
      %c0_18 = arith.constant 0 : index
      %c0_19 = arith.constant 0 : index
      %20 = vector.load %arg6[%c0_18, %c0_19] : memref<1x128xf32, #tpu.memory_space<vmem>>, vector<1x128xf32>
      %21 = vector.broadcast %20 : vector<1x128xf32> to vector<16x128xf32>
      %22 = arith.addf %19, %21 : vector<16x128xf32>
      %c0_20 = arith.constant 0 : index
      %c0_21 = arith.constant 0 : index
      %23 = vector.load %arg7[%c0_20, %c0_21] : memref<16x128xf32, #tpu.memory_space<vmem>>, vector<16x128xf32>
      tpu.vector_store %arg7[%c0_20, %c0_21], %22 {strides = array<i32>} : memref<16x128xf32, #tpu.memory_space<vmem>>, vector<16x128xf32>,
    } else {
    }
    return
  }
  func.func @transform_0(%arg0: i32, %arg1: i32) -> (i32, i32) {
    %c0_i32 = arith.constant 0 : i32
    return %arg0, %arg1 : i32, i32
  }
  func.func @transform_1(%arg0: i32, %arg1: i32) -> (i32, i32) {
    %c0_i32 = arith.constant 0 : i32
    %c0_i32_0 = arith.constant 0 : i32
    return %arg1, %c0_i32 : i32, i32
  }
  func.func @transform_2(%arg0: i32, %arg1: i32) -> (i32, i32) {
    %c0_i32 = arith.constant 0 : i32
    %c0_i32_0 = arith.constant 0 : i32
    %c0_i32_1 = arith.constant 0 : i32
    return %c0_i32, %c0_i32_0 : i32, i32
  }
  func.func @transform_3(%arg0: i32, %arg1: i32) -> (i32, i32) {
    %c0_i32 = arith.constant 0 : i32
    %c0_i32_0 = arith.constant 0 : i32
    %c0_i32_1 = arith.constant 0 : i32
    return %c0_i32, %c0_i32_0 : i32, i32
  }
  func.func @transform_4(%arg0: i32, %arg1: i32) -> (i32, i32) {
    %c0_i32 = arith.constant 0 : i32
    %c0_i32_0 = arith.constant 0 : i32
    %c0_i32_1 = arith.constant 0 : i32
    return %c0_i32, %c0_i32_0 : i32, i32
  }
  func.func @transform_5(%arg0: i32, %arg1: i32) -> (i32, i32) {
    %c0_i32 = arith.constant 0 : i32
    %c0_i32_0 = arith.constant 0 : i32
    return %arg0, %c0_i32 : i32, i32
  }
}

</mosaic_0001>

<bundles_post_ra>
// kernel: two_layer_tfidf_forward.1
= control target key start
LH: loop header
LB: loop body
LE: loop exit
PB: predicated region body
PF: predicated region fallthrough
CT: control target
= control target key end

     0   :  { %vm24_vm0 = vcmask 261120   ;;  %v140_v2 = vmov 0.0   ;;  %s221_s1 = inlined_call_operand.vmem [shape: f32[32,32], index: 1, kind: input, shape index: {}]   ;;  %s222_s0 = inlined_call_operand.vmem [shape: f32[16,32], index: 0, kind: input, shape index: {}]   ;;  %s223_s2 = inlined_call_operand.vmem [shape: f32[1,32], index: 2, kind: input, shape index: {}]   ;;  %s224_s4 = inlined_call_operand.vmem [shape: f32[1,128], index: 4, kind: input, shape index: {}]   ;;  %s225_s3 = inlined_call_operand.vmem [shape: f32[32,128], index: 3, kind: input, shape index: {}]   ;;  %s226_s5 = inlined_call_operand.vmem [shape: f32[16,128], index: 5, kind: output, shape index: {}]  }
   0x1   :  { %v34_v0 = vld [vmem:[%s221_s1 + $0x18] sm:$0xff]  ;;  %v33_v1 = vld [vmem:[%s221_s1 + $0x10] sm:$0xff]  ;;  %26 = vst.msk [vmem:[#allocation2 + $0x8] sm:$0xff] %vm24_vm0, %v140_v2  ;;  %v32_v3 = vld [vmem:[%s221_s1 + $0x8] sm:$0xff] }
   0x2   :  { %129 = vmatpush.msra.mxu2 %v34_v0  ;;  %54 = vmatpush.msra.mxu0 %v34_v0  ;;  %25 = vst.msk [vmem:[#allocation2] sm:$0xff] %vm24_vm0, %v140_v2  ;;  %v31_v4 = vld [vmem:[%s221_s1] sm:$0xff]  ;;  %v30_v5 = vld [vmem:[%s222_s0 + $0x8] sm:$0xff]  ;;  %v85_v7 = vld [vmem:[%s225_s3 + $0x18] sm:$0xff] }
   0x3   :  { %v29_v6 = vld [vmem:[%s222_s0] sm:$0xff]  ;;  %v84_v8 = vld [vmem:[%s225_s3 + $0x10] sm:$0xff]  ;;  %133 = vmatpush.msra.mxu3 %v85_v7  ;;  %108 = vmatpush.msra.mxu1 %v85_v7  ;;  %v83_v9 = vld [vmem:[%s225_s3 + $0x8] sm:$0xff] }
   0x4   :  { %130 = vmatpush.msra.mxu2 %v33_v1  ;;  %55 = vmatpush.msra.mxu0 %v33_v1  ;;  %v82_v10 = vld [vmem:[%s225_s3] sm:$0xff] }
   0x5   :  { %134 = vmatpush.msra.mxu3 %v84_v8  ;;  %109 = vmatpush.msra.mxu1 %v84_v8  ;;  %v138_v17 = vld [vmem:[%s223_s2] ss:$0 sm:$0xff] }
   0x6   :  { %131 = vmatpush.msra.mxu2 %v32_v3  ;;  %56 = vmatpush.msra.mxu0 %v32_v3  ;;  %v139_v24 = vld [vmem:[%s224_s4] ss:$0 sm:$0xff] }
   0x7   :  { %135 = vmatpush.msra.mxu3 %v83_v9  ;;  %110 = vmatpush.msra.mxu1 %v83_v9 }
   0x8   :  { %132 = vmatpush.msra.mxu2 %v31_v4  ;;  %57 = vmatpush.msra.mxu0 %v31_v4  ;;  %v28_v14 = vld [vmem:[#allocation2 + $0x8] sm:$0xff] }
   0x9   :  { %126 = vmatmul.msk.f32.vlgmr.msra.gmra.mxu2 %vm24_vm0, %v30_v5  ;;  %125 = vmatmul.msk.f32.vlgmr.msra.gmra.mxu0 %vm24_vm0, %v29_v6  ;;  %v27_v11 = vld [vmem:[#allocation2] sm:$0xff] }
   0xa   :  { %136 = vmatpush.msra.mxu3 %v82_v10  ;;  %111 = vmatpush.msra.mxu1 %v82_v10 }
  0x86   :  { %v59_v12 = vpop.f32.mrf.mxu0 }
  0x87   :  { %v65_v13 = vadd.f32 %v59_v12, %v27_v11 }
  0x89   :  { %67 = vst.msk [vmem:[#allocation2] sm:$0xff] %vm24_vm0, %v65_v13 }
  0x8c   :  { %v62_v15 = vpop.f32.mrf.mxu2 }
  0x8d   :  { %v66_v16 = vadd.f32 %v62_v15, %v28_v14 }
  0x8f   :  { %68 = vst.msk [vmem:[#allocation2 + $0x8] sm:$0xff] %vm24_vm0, %v66_v16 }
  0x90   :  { %v72_v18 = vld [vmem:[#allocation2] sm:$0xff] }
  0x91   :  { %v78_v19 = vadd.f32 %v138_v17, %v72_v18 }
  0x93   :  { %v80_v20 = vmax.f32 %v78_v19, 0.0 }
  0x95   :  { %127 = vmatmul.msk.f32.vlgmr.msra.gmra.mxu1 %vm24_vm0, %v80_v20 }
  0x96   :  { %v73_v21 = vld [vmem:[#allocation2 + $0x8] sm:$0xff] }
  0x97   :  { %v79_v22 = vadd.f32 %v138_v17, %v73_v21 }
  0x99   :  { %v81_v23 = vmax.f32 %v79_v22, 0.0 }
  0x9b   :  { %128 = vmatmul.msk.f32.vlgmr.msra.gmra.mxu3 %vm24_vm0, %v81_v23 }
 0x112   :  { %v113_v25 = vpop.f32.mrf.mxu1 }
 0x113   :  { %v114_v26 = vadd.f32 %v139_v24, %v113_v25 }
 0x115   :  { %119 = vst [vmem:[%s226_s5] sm:$0xff] %v114_v26 }
 0x11e   :  { %v116_v27 = vpop.f32.mrf.mxu3 }
 0x11f   :  { %v117_v28 = vadd.f32 %v139_v24, %v116_v27 }
 0x121   :  { %120 = vst [vmem:[%s226_s5 + $0x8] sm:$0xff] %v117_v28 }

</bundles_post_ra>
